<compile_context>
chip_gen: v5e
topology: v5e:2x2
jax: 0.10.0
libtpu: 0.0.40
codegen_flags: <defaults>
</compile_context>

<pallas_src>
import jax
import jax.numpy as jnp
from jax import lax
from jax.experimental import pallas as pl
from jax.experimental.pallas import tpu as pltpu

BN_EPS = 1e-3
WS_EPS = 1e-5


# ----------------------------------------------------------------------------- helpers
def _ws_standardize(w_oihw):
    """WSConv2d weight standardization (PyTorch semantics: unbiased std, eps on std)."""
    mean = jnp.mean(w_oihw, axis=(1, 2, 3), keepdims=True)
    wc = w_oihw - mean
    std = jnp.std(wc.reshape(w_oihw.shape[0], -1), axis=1, ddof=1)
    std = std.reshape(-1, 1, 1, 1) + WS_EPS
    return wc / std


def conv_bn_ws(x, p, *, skip_bn=False, head=None, rgb=None):
    """Fused (BN -> ReLU ->) weight-standardized conv2d, stride 1, zero pad, no bias.

    x: (N, H, W, Cin) f32, NOT padded, NOT batch-normed (unless skip_bn).
    head: None | 'sigmoid' | 'tanh_rgb'  (Cout must be 1 for heads; output is (N,H,W)).
    """
    w = _ws_standardize(p['w']).astype(jnp.float32)
    Cout, Cin, K, _ = w.shape
    pad, dil = p['pad'], p['dil']
    N, H, W, _ = x.shape
    Hp, Wp = H + 2 * pad, W + 2 * pad
    Ho, Wo = Hp - (K - 1) * dil, Wp - (K - 1) * dil

    if skip_bn:
        scale = jnp.ones((Cin,), jnp.float32)
        shift = jnp.zeros((Cin,), jnp.float32)
    else:
        scale = p['gamma'] * lax.rsqrt(p['rv'] + BN_EPS)
        shift = p['beta'] - p['rm'] * scale
    ss = jnp.stack([scale, shift], axis=0)                       # (2, Cin) f32

    # ---------------- regular conv: MXU matmul path (bf16 in, f32 accumulate) ----------
    if head is None:
        wk = jnp.transpose(w, (2, 3, 1, 0)).reshape(K * K, Cin, Cout).astype(jnp.bfloat16)
        extra = ((K - 1) * dil + Wp - 1) // Wp if K > 1 else 0   # zero guard rows

        def kernel(x_ref, ss_ref, w_ref, o_ref):
            sc = ss_ref[0, :].reshape(1, 1, Cin)
            sh = ss_ref[1, :].reshape(1, 1, Cin)
            xb = jnp.maximum(x_ref[0] * sc + sh, 0.0)            # fused BN + ReLU (f32)
            xb = xb.astype(jnp.bfloat16)
            if pad > 0:                                          # rebuild zero pad in VMEM
                zc = jnp.zeros((H, pad, Cin), jnp.bfloat16)
                xb = jnp.concatenate([zc, xb, zc], axis=1)
                zr = jnp.zeros((pad, Wp, Cin), jnp.bfloat16)
                xb = jnp.concatenate([zr, xb, zr], axis=0)
            if extra > 0:
                xb = jnp.concatenate(
                    [xb, jnp.zeros((extra, Wp, Cin), jnp.bfloat16)], axis=0)
            xf = xb.reshape((Hp + extra) * Wp, Cin)              # flatten ONCE
            acc = jnp.zeros((Ho * Wp, Cout), jnp.float32)
            for kh in range(K):
                for kw in range(K):
                    s = kh * dil * Wp + kw * dil
                    acc = acc + jnp.dot(xf[s:s + Ho * Wp, :], w_ref[kh * K + kw],
                                        preferred_element_type=jnp.float32)
            out = acc.reshape(Ho, Wp, Cout)
            if Wo < Wp:
                out = out[:, :Wo, :]                             # crop invalid columns once
            o_ref[...] = out[None]

        return pl.pallas_call(
            kernel,
            out_shape=jax.ShapeDtypeStruct((N, Ho, Wo, Cout), jnp.float32),
            grid=(N,),
            in_specs=[
                pl.BlockSpec((1, H, W, Cin), lambda n: (n, 0, 0, 0)),
                pl.BlockSpec((2, Cin), lambda n: (0, 0)),
                pl.BlockSpec((K * K, Cin, Cout), lambda n: (0, 0, 0)),
            ],
            out_specs=pl.BlockSpec((1, Ho, Wo, Cout), lambda n: (n, 0, 0, 0)),
            compiler_params=pltpu.CompilerParams(
                dimension_semantics=("parallel",)),
        )(x, ss, wk)

    # ---------------- 1-channel head: VPU mul + lane-reduce, lane-dense (N,H,W) output --
    assert Cout == 1
    wh = jnp.transpose(w, (2, 3, 1, 0)).reshape(K * K, Cin)      # f32
    use_rgb = (head == 'tanh_rgb')

    def head_kernel(*refs):
        if use_rgb:
            x_ref, ss_ref, w_ref, rgb_ref, o_ref = refs
        else:
            x_ref, ss_ref, w_ref, o_ref = refs
        sc = ss_ref[0, :].reshape(1, 1, Cin)
        sh = ss_ref[1, :].reshape(1, 1, Cin)
        xb = jnp.maximum(x_ref[0] * sc + sh, 0.0)                # fused BN + ReLU (f32)
        if pad > 0:
            zc = jnp.zeros((H, pad, Cin), jnp.float32)
            xb = jnp.concatenate([zc, xb, zc], axis=1)
            zr = jnp.zeros((pad, Wp, Cin), jnp.float32)
            xb = jnp.concatenate([zr, xb, zr], axis=0)
        acc = jnp.zeros((Ho, Wo), jnp.float32)
        for kh in range(K):
            for kw in range(K):
                a, b = kh * dil, kw * dil
                wt = w_ref[kh * K + kw].reshape(1, 1, Cin)
                acc = acc + jnp.sum(xb[a:a + Ho, b:b + Wo, :] * wt, axis=-1)
        if head == 'sigmoid':
            out = jax.nn.sigmoid(acc)
        else:                                                    # tanh(x + 0.1*mean_c(rgb))
            out = jnp.tanh(acc + 0.1 * jnp.mean(rgb_ref[0], axis=-1))
        o_ref[...] = out[None]

    in_specs = [
        pl.BlockSpec((1, H, W, Cin), lambda n: (n, 0, 0, 0)),
        pl.BlockSpec((2, Cin), lambda n: (0, 0)),
        pl.BlockSpec((K * K, Cin), lambda n: (0, 0)),
    ]
    args = [x, ss, wh]
    if use_rgb:
        Crgb = rgb.shape[-1]
        in_specs.append(pl.BlockSpec((1, Ho, Wo, Crgb), lambda n: (n, 0, 0, 0)))
        args.append(rgb)

    return pl.pallas_call(
        head_kernel,
        out_shape=jax.ShapeDtypeStruct((N, Ho, Wo), jnp.float32),
        grid=(N,),
        in_specs=in_specs,
        out_specs=pl.BlockSpec((1, Ho, Wo), lambda n: (n, 0, 0)),
        compiler_params=pltpu.CompilerParams(
            dimension_semantics=("parallel",)),
    )(*args)


def bn_relu(x, p):
    # Eval-mode BatchNorm2d (running stats, eps=1e-3) + ReLU.  Only used before upsampling
    # (upConvLayer), where BN/ReLU cannot be fused into the following conv.
    y = (x - p['rm']) * lax.rsqrt(p['rv'] + BN_EPS) * p['gamma'] + p['beta']
    return jnp.maximum(y, 0.0)


def _lin_up2(x, axis):
    """Exact 2x linear upsample along `axis`: half-pixel centers, edge clamp
    (== F.interpolate(scale_factor=2, mode='bilinear', align_corners=False) per-axis)."""
    n = x.shape[axis]
    first = lax.slice_in_dim(x, 0, 1, axis=axis)
    last = lax.slice_in_dim(x, n - 1, n, axis=axis)
    prev = jnp.concatenate([first, lax.slice_in_dim(x, 0, n - 1, axis=axis)], axis=axis)
    nxt = jnp.concatenate([lax.slice_in_dim(x, 1, n, axis=axis), last], axis=axis)
    even = 0.75 * x + 0.25 * prev
    odd = 0.75 * x + 0.25 * nxt
    out = jnp.stack([even, odd], axis=axis + 1)
    shape = list(x.shape)
    shape[axis] = 2 * n
    return out.reshape(shape)


def up2(x):
    # Separable 2x bilinear upsample over (H, W); works for (N,H,W) and (N,H,W,C).
    return _lin_up2(_lin_up2(x, 1), 2)


def apply_myconv(p, x):
    # myConv = BN -> ReLU -> WSConv2d   (BN+ReLU fused into the Pallas conv kernel)
    return conv_bn_ws(x, p)


def apply_upconv(p, x):
    # upConvLayer = BN -> ReLU -> bilinear x2 -> WSConv2d(3x3, pad 1)
    return conv_bn_ws(up2(bn_relu(x, p)), p, skip_bn=True)


# ----------------------------------------------------------------------------- params
def make_myconv(key, in_ch, out_ch, k, pad, dil=1):
    k1, k2, k3 = jax.random.split(key, 3)
    return dict(
        w=jax.random.normal(k1, (out_ch, in_ch, k, k), jnp.float32) * 0.1,
        gamma=1.0 + 0.02 * jax.random.normal(k2, (in_ch,), jnp.float32),
        beta=0.02 * jax.random.normal(k3, (in_ch,), jnp.float32),
        rm=jnp.zeros((in_ch,), jnp.float32),
        rv=jnp.ones((in_ch,), jnp.float32),
        pad=pad, dil=dil)


def init_params(key, dimList):
    D4 = dimList[4]
    f = D4 // 2                      # ASPP in_feat
    keys = iter(jax.random.split(key, 64))
    P = {}
    # Dilated_bottleNeck_lv6
    P['aspp_red1'] = make_myconv(next(keys), f * 2, f // 2, 3, 1)
    P['aspp_d3_1'] = make_myconv(next(keys), f // 2, f // 4, 1, 0)
    P['aspp_d3_2'] = make_myconv(next(keys), f // 4, f // 4, 3, 3, 3)
    P['aspp_d6_1'] = make_myconv(next(keys), f // 2 + f // 4, f // 4, 1, 0)
    P['aspp_d6_2'] = make_myconv(next(keys), f // 4, f // 4, 3, 6, 6)
    P['aspp_d12_1'] = make_myconv(next(keys), f, f // 4, 1, 0)
    P['aspp_d12_2'] = make_myconv(next(keys), f // 4, f // 4, 3, 12, 12)
    P['aspp_d18_1'] = make_myconv(next(keys), f + f // 4, f // 4, 1, 0)
    P['aspp_d18_2'] = make_myconv(next(keys), f // 4, f // 4, 3, 18, 18)
    P['aspp_red2'] = make_myconv(next(keys), f // 4 * 4 + f // 2, f, 3, 1)
    # decoder1
    P['dec1'] = [make_myconv(next(keys), D4 // 2, D4 // 4, 3, 1),
                 make_myconv(next(keys), D4 // 4, D4 // 8, 3, 1),
                 make_myconv(next(keys), D4 // 8, D4 // 16, 3, 1),
                 make_myconv(next(keys), D4 // 16, D4 // 32, 3, 1),
                 make_myconv(next(keys), D4 // 32, 1, 3, 1)]
    # decoder2 level lv5
    P['up1'] = make_myconv(next(keys), D4 // 2, D4 // 4, 3, 1)
    P['reduc1'] = make_myconv(next(keys), D4 // 4 + dimList[3], D4 // 4 - 4, 1, 0)
    P['d2_1'] = make_myconv(next(keys), D4 // 4, D4 // 4, 3, 1)
    P['d2_2'] = make_myconv(next(keys), D4 // 4, D4 // 8, 3, 1)
    P['d2_3'] = make_myconv(next(keys), D4 // 8, D4 // 16, 3, 1)
    P['d2_4'] = make_myconv(next(keys), D4 // 16, 1, 3, 1)
    # level lv4
    P['up2'] = make_myconv(next(keys), D4 // 4, D4 // 8, 3, 1)
    P['reduc2'] = make_myconv(next(keys), D4 // 8 + dimList[2], D4 // 8 - 4, 1, 0)
    P['d21_1'] = make_myconv(next(keys), D4 // 8, D4 // 8, 3, 1)
    P['d21_2'] = make_myconv(next(keys), D4 // 8, D4 // 16, 3, 1)
    P['d21_3'] = make_myconv(next(keys), D4 // 16, 1, 3, 1)
    # level lv3
    P['up3'] = make_myconv(next(keys), D4 // 8, D4 // 16, 3, 1)
    P['reduc3'] = make_myconv(next(keys), D4 // 16 + dimList[1], D4 // 16 - 4, 1, 0)
    P['d211_1'] = make_myconv(next(keys), D4 // 16, D4 // 16, 3, 1)
    P['d211_2'] = make_myconv(next(keys), D4 // 16, 1, 3, 1)
    # level lv2
    P['up4'] = make_myconv(next(keys), D4 // 16, D4 // 32, 3, 1)
    P['reduc4'] = make_myconv(next(keys), D4 // 32 + dimList[0], D4 // 32 - 4, 1, 0)
    P['d2111_1'] = make_myconv(next(keys), D4 // 32, D4 // 32, 3, 1)
    P['d2111_2'] = make_myconv(next(keys), D4 // 32, 1, 3, 1)
    # level lv1
    P['up5'] = make_myconv(next(keys), D4 // 32, D4 // 32 - 4, 3, 1)
    P['d21111_1'] = make_myconv(next(keys), D4 // 32, D4 // 32, 3, 1)
    P['d21111_2'] = make_myconv(next(keys), D4 // 32, D4 // 64, 3, 1)
    P['d21111_3'] = make_myconv(next(keys), D4 // 64, 1, 3, 1)
    return P


# ----------------------------------------------------------------------------- forward
def lap_decoder_forward(P, x, rgb, max_depth):
    cat1, cat2, cat3, cat4, dense_feat = x
    rgb_lv6, rgb_lv5, rgb_lv4, rgb_lv3, rgb_lv2, rgb_lv1 = rgb

    # ASPP (Dilated_bottleNeck_lv6)
    z = apply_myconv(P['aspp_red1'], dense_feat)
    d3 = apply_myconv(P['aspp_d3_2'], apply_myconv(P['aspp_d3_1'], z))
    c1 = jnp.concatenate([z, d3], axis=-1)
    d6 = apply_myconv(P['aspp_d6_2'], apply_myconv(P['aspp_d6_1'], c1))
    c2 = jnp.concatenate([c1, d6], axis=-1)
    d12 = apply_myconv(P['aspp_d12_2'], apply_myconv(P['aspp_d12_1'], c2))
    c3 = jnp.concatenate([c2, d12], axis=-1)
    d18 = apply_myconv(P['aspp_d18_2'], apply_myconv(P['aspp_d18_1'], c3))
    dense = apply_myconv(P['aspp_red2'],
                         jnp.concatenate([z, d3, d6, d12, d18], axis=-1))

    # decoder1 -> lap_lv6 (sigmoid fused into the last conv; lane-dense (N,H,W))
    h = dense
    for p in P['dec1'][:-1]:
        h = apply_myconv(p, h)
    lap_lv6 = conv_bn_ws(h, P['dec1'][-1], head='sigmoid')
    lap_lv6_up = up2(lap_lv6)

    # level lv5
    dec2 = apply_upconv(P['up1'], dense)
    dec2 = apply_myconv(P['reduc1'], jnp.concatenate([dec2, cat4], axis=-1))
    dec2_up = apply_myconv(
        P['d2_1'], jnp.concatenate([dec2, lap_lv6_up[..., None], rgb_lv5], axis=-1))
    dec2 = apply_myconv(P['d2_2'], dec2_up)
    dec2 = apply_myconv(P['d2_3'], dec2)
    lap_lv5 = conv_bn_ws(dec2, P['d2_4'], head='tanh_rgb', rgb=rgb_lv5)
    lap_lv5_up = up2(lap_lv5)

    # level lv4
    dec3 = apply_upconv(P['up2'], dec2_up)
    dec3 = apply_myconv(P['reduc2'], jnp.concatenate([dec3, cat3], axis=-1))
    dec3_up = apply_myconv(
        P['d21_1'], jnp.concatenate([dec3, lap_lv5_up[..., None], rgb_lv4], axis=-1))
    dec3 = apply_myconv(P['d21_2'], dec3_up)
    lap_lv4 = conv_bn_ws(dec3, P['d21_3'], head='tanh_rgb', rgb=rgb_lv4)
    lap_lv4_up = up2(lap_lv4)

    # level lv3
    dec4 = apply_upconv(P['up3'], dec3_up)
    dec4 = apply_myconv(P['reduc3'], jnp.concatenate([dec4, cat2], axis=-1))
    dec4_up = apply_myconv(
        P['d211_1'], jnp.concatenate([dec4, lap_lv4_up[..., None], rgb_lv3], axis=-1))
    lap_lv3 = conv_bn_ws(dec4_up, P['d211_2'], head='tanh_rgb', rgb=rgb_lv3)
    lap_lv3_up = up2(lap_lv3)

    # level lv2
    dec5 = apply_upconv(P['up4'], dec4_up)
    dec5 = apply_myconv(P['reduc4'], jnp.concatenate([dec5, cat1], axis=-1))
    dec5_up = apply_myconv(
        P['d2111_1'], jnp.concatenate([dec5, lap_lv3_up[..., None], rgb_lv2], axis=-1))
    lap_lv2 = conv_bn_ws(dec5_up, P['d2111_2'], head='tanh_rgb', rgb=rgb_lv2)
    lap_lv2_up = up2(lap_lv2)

    # level lv1
    dec6 = apply_upconv(P['up5'], dec5_up)
    dec6 = apply_myconv(
        P['d21111_1'], jnp.concatenate([dec6, lap_lv2_up[..., None], rgb_lv1], axis=-1))
    dec6 = apply_myconv(P['d21111_2'], dec6)
    lap_lv1 = conv_bn_ws(dec6, P['d21111_3'], head='tanh_rgb', rgb=rgb_lv1)

    # Laplacian pyramid reconstruction (all lane-dense (N,H,W))
    lap_lv5_img = lap_lv5 + lap_lv6_up
    lap_lv4_img = lap_lv4 + up2(lap_lv5_img)
    lap_lv3_img = lap_lv3 + up2(lap_lv4_img)
    lap_lv2_img = lap_lv2 + up2(lap_lv3_img)
    final_depth = jax.nn.sigmoid(lap_lv1 + up2(lap_lv2_img))

    laps = [(l * max_depth)[..., None]
            for l in (lap_lv6, lap_lv5, lap_lv4, lap_lv3, lap_lv2, lap_lv1)]
    return laps, (final_depth * max_depth)[..., None]


# ----------------------------------------------------------------------------- main
if __name__ == "__main__":
    key = jax.random.PRNGKey(0)
    N = 2
    dimList = [16, 24, 40, 64, 256]   # encoder channel dims, dimList[4] densest
    max_depth = 80.0
    Hd = Wd = 2                       # spatial size of the densest feature (lv6)

    kp, *ikeys = jax.random.split(key, 12)
    params = init_params(kp, dimList)

    def rnd(k, shape):
        return jax.random.normal(k, shape, jnp.float32)

    # encoder features (NHWC): cat1..cat4 at increasing resolution, dense_feat smallest
    x_in = [
        rnd(ikeys[0], (N, Hd * 16, Wd * 16, dimList[0])),   # cat1
        rnd(ikeys[1], (N, Hd * 8,  Wd * 8,  dimList[1])),   # cat2
        rnd(ikeys[2], (N, Hd * 4,  Wd * 4,  dimList[2])),   # cat3
        rnd(ikeys[3], (N, Hd * 2,  Wd * 2,  dimList[3])),   # cat4
        rnd(ikeys[4], (N, Hd,      Wd,      dimList[4])),   # dense_feat
    ]
    # rgb pyramid (3-channel), lv6 smallest ... lv1 full resolution
    rgb_in = [
        rnd(ikeys[5],  (N, Hd,      Wd,      3)),           # rgb_lv6 (unused)
        rnd(ikeys[6],  (N, Hd * 2,  Wd * 2,  3)),           # rgb_lv5
        rnd(ikeys[7],  (N, Hd * 4,  Wd * 4,  3)),           # rgb_lv4
        rnd(ikeys[8],  (N, Hd * 8,  Wd * 8,  3)),           # rgb_lv3
        rnd(ikeys[9],  (N, Hd * 16, Wd * 16, 3)),           # rgb_lv2
        rnd(ikeys[10], (N, Hd * 32, Wd * 32, 3)),           # rgb_lv1
    ]

    laps, final_depth = lap_decoder_forward(params, x_in, rgb_in, max_depth)
    jax.block_until_ready(final_depth)
    for lap in laps:
        jax.block_until_ready(lap)

    assert final_depth.shape == (N, Hd * 32, Wd * 32, 1)
    assert laps[0].shape == (N, Hd, Wd, 1)
    assert laps[-1].shape == (N, Hd * 32, Wd * 32, 1)
    assert bool(jnp.all(jnp.isfinite(final_depth)))
    print("KERNEL_OK")
</pallas_src>

<mosaic_0001>
module attributes {stable_mosaic.version = 11 : i64} {
  func.func @kernel(%arg0: i32, %arg1: memref<1x2x2x256xf32, #tpu.memory_space<vmem>>, %arg2: memref<2x256xf32, #tpu.memory_space<vmem>>, %arg3: memref<9x256x64xbf16, #tpu.memory_space<vmem>>, %arg4: memref<1x2x2x64xf32, #tpu.memory_space<vmem>>) attributes {dimension_semantics = [#tpu.dimension_semantics<parallel>], iteration_bounds = array<i64: 2>, scalar_prefetch = 0 : i64, scratch_operands = 0 : i64, tpu.core_type = #tpu.core_type<tc>, window_params = [{transform_indices = @transform_0, window_bounds = array<i64: 1, 2, 2, 256>}, {pipeline_mode = #tpu.pipeline_mode<synchronous>, transform_indices = @transform_1, window_bounds = array<i64: 2, 256>}, {pipeline_mode = #tpu.pipeline_mode<synchronous>, transform_indices = @transform_2, window_bounds = array<i64: 9, 256, 64>}, {transform_indices = @transform_3, window_bounds = array<i64: 1, 2, 2, 64>}]} {
    %c0 = arith.constant 0 : index
    %c0_0 = arith.constant 0 : index
    %0 = vector.load %arg2[%c0, %c0_0] : memref<2x256xf32, #tpu.memory_space<vmem>>, vector<1x256xf32>
    %1 = vector.shape_cast %0 : vector<1x256xf32> to vector<256xf32>
    %2 = vector.shape_cast %1 : vector<256xf32> to vector<1x1x256xf32>
    %c1 = arith.constant 1 : index
    %c0_1 = arith.constant 0 : index
    %3 = vector.load %arg2[%c1, %c0_1] : memref<2x256xf32, #tpu.memory_space<vmem>>, vector<1x256xf32>
    %4 = vector.shape_cast %3 : vector<1x256xf32> to vector<256xf32>
    %5 = vector.shape_cast %4 : vector<256xf32> to vector<1x1x256xf32>
    %c0_2 = arith.constant 0 : index
    %c0_3 = arith.constant 0 : index
    %c0_4 = arith.constant 0 : index
    %c0_5 = arith.constant 0 : index
    %6 = vector.load %arg1[%c0_2, %c0_3, %c0_4, %c0_5] : memref<1x2x2x256xf32, #tpu.memory_space<vmem>>, vector<1x2x2x256xf32>
    %7 = vector.shape_cast %6 : vector<1x2x2x256xf32> to vector<2x2x256xf32>
    %8 = vector.broadcast %2 : vector<1x1x256xf32> to vector<2x2x256xf32>
    %9 = arith.mulf %7, %8 : vector<2x2x256xf32>
    %10 = vector.broadcast %5 : vector<1x1x256xf32> to vector<2x2x256xf32>
    %11 = arith.addf %9, %10 : vector<2x2x256xf32>
    %cst = arith.constant 0.000000e+00 : f32
    %12 = vector.broadcast %cst : f32 to vector<2x2x256xf32>
    %13 = arith.maximumf %11, %12 : vector<2x2x256xf32>
    %14 = arith.truncf %13 : vector<2x2x256xf32> to vector<2x2x256xbf16>
    %cst_6 = arith.constant 0.000000e+00 : bf16
    %15 = vector.broadcast %cst_6 : bf16 to vector<2x1x256xbf16>
    %16 = tpu.concatenate %15, %14, %15 in 1 : vector<2x1x256xbf16>, vector<2x2x256xbf16>, vector<2x1x256xbf16> -> vector<2x4x256xbf16>
    %cst_7 = arith.constant 0.000000e+00 : bf16
    %17 = vector.broadcast %cst_7 : bf16 to vector<1x4x256xbf16>
    %18 = tpu.concatenate %17, %16, %17 in 0 : vector<1x4x256xbf16>, vector<2x4x256xbf16>, vector<1x4x256xbf16> -> vector<4x4x256xbf16>
    %cst_8 = arith.constant 0.000000e+00 : bf16
    %19 = vector.broadcast %cst_8 : bf16 to vector<1x4x256xbf16>
    %20 = tpu.concatenate %18, %19 in 0 : vector<4x4x256xbf16>, vector<1x4x256xbf16> -> vector<5x4x256xbf16>
    %21 = vector.shape_cast %20 : vector<5x4x256xbf16> to vector<20x256xbf16>
    %cst_9 = arith.constant 0.000000e+00 : f32
    %22 = vector.broadcast %cst_9 : f32 to vector<8x64xf32>
    %23 = vector.extract_strided_slice %21 {offsets = [0, 0], sizes = [8, 256], strides = [1, 1]} : vector<20x256xbf16> to vector<8x256xbf16>
    %c0_10 = arith.constant 0 : index
    %c0_11 = arith.constant 0 : index
    %c0_12 = arith.constant 0 : index
    %24 = vector.load %arg3[%c0_10, %c0_11, %c0_12] : memref<9x256x64xbf16, #tpu.memory_space<vmem>>, vector<1x256x64xbf16>
    %25 = vector.shape_cast %24 : vector<1x256x64xbf16> to vector<256x64xbf16>
    %cst_13 = arith.constant dense<0.000000e+00> : vector<8x64xf32>
    %26 = tpu.matmul %23, %25, %cst_13 {dimension_numbers = #tpu.dot_dimension_numbers<[1], [0], [0], [1], [0, 0, 1, 1], [], []>} : vector<8x256xbf16>, vector<256x64xbf16>, vector<8x64xf32> -> vector<8x64xf32>
    %27 = arith.addf %22, %26 : vector<8x64xf32>
    %28 = vector.extract_strided_slice %21 {offsets = [1, 0], sizes = [8, 256], strides = [1, 1]} : vector<20x256xbf16> to vector<8x256xbf16>
    %c1_14 = arith.constant 1 : index
    %c0_15 = arith.constant 0 : index
    %c0_16 = arith.constant 0 : index
    %29 = vector.load %arg3[%c1_14, %c0_15, %c0_16] : memref<9x256x64xbf16, #tpu.memory_space<vmem>>, vector<1x256x64xbf16>
    %30 = vector.shape_cast %29 : vector<1x256x64xbf16> to vector<256x64xbf16>
    %cst_17 = arith.constant dense<0.000000e+00> : vector<8x64xf32>
    %31 = tpu.matmul %28, %30, %cst_17 {dimension_numbers = #tpu.dot_dimension_numbers<[1], [0], [0], [1], [0, 0, 1, 1], [], []>} : vector<8x256xbf16>, vector<256x64xbf16>, vector<8x64xf32> -> vector<8x64xf32>
    %32 = arith.addf %27, %31 : vector<8x64xf32>
    %33 = vector.extract_strided_slice %21 {offsets = [2, 0], sizes = [8, 256], strides = [1, 1]} : vector<20x256xbf16> to vector<8x256xbf16>
    %c2 = arith.constant 2 : index
    %c0_18 = arith.constant 0 : index
    %c0_19 = arith.constant 0 : index
    %34 = vector.load %arg3[%c2, %c0_18, %c0_19] : memref<9x256x64xbf16, #tpu.memory_space<vmem>>, vector<1x256x64xbf16>
    %35 = vector.shape_cast %34 : vector<1x256x64xbf16> to vector<256x64xbf16>
    %cst_20 = arith.constant dense<0.000000e+00> : vector<8x64xf32>
    %36 = tpu.matmul %33, %35, %cst_20 {dimension_numbers = #tpu.dot_dimension_numbers<[1], [0], [0], [1], [0, 0, 1, 1], [], []>} : vector<8x256xbf16>, vector<256x64xbf16>, vector<8x64xf32> -> vector<8x64xf32>
    %37 = arith.addf %32, %36 : vector<8x64xf32>
    %38 = vector.extract_strided_slice %21 {offsets = [4, 0], sizes = [8, 256], strides = [1, 1]} : vector<20x256xbf16> to vector<8x256xbf16>
    %c3 = arith.constant 3 : index
    %c0_21 = arith.constant 0 : index
    %c0_22 = arith.constant 0 : index
    %39 = vector.load %arg3[%c3, %c0_21, %c0_22] : memref<9x256x64xbf16, #tpu.memory_space<vmem>>, vector<1x256x64xbf16>
    %40 = vector.shape_cast %39 : vector<1x256x64xbf16> to vector<256x64xbf16>
    %cst_23 = arith.constant dense<0.000000e+00> : vector<8x64xf32>
    %41 = tpu.matmul %38, %40, %cst_23 {dimension_numbers = #tpu.dot_dimension_numbers<[1], [0], [0], [1], [0, 0, 1, 1], [], []>} : vector<8x256xbf16>, vector<256x64xbf16>, vector<8x64xf32> -> vector<8x64xf32>
    %42 = arith.addf %37, %41 : vector<8x64xf32>
    %43 = vector.extract_strided_slice %21 {offsets = [5, 0], sizes = [8, 256], strides = [1, 1]} : vector<20x256xbf16> to vector<8x256xbf16>
    %c4 = arith.constant 4 : index
    %c0_24 = arith.constant 0 : index
    %c0_25 = arith.constant 0 : index
    %44 = vector.load %arg3[%c4, %c0_24, %c0_25] : memref<9x256x64xbf16, #tpu.memory_space<vmem>>, vector<1x256x64xbf16>
    %45 = vector.shape_cast %44 : vector<1x256x64xbf16> to vector<256x64xbf16>
    %cst_26 = arith.constant dense<0.000000e+00> : vector<8x64xf32>
    %46 = tpu.matmul %43, %45, %cst_26 {dimension_numbers = #tpu.dot_dimension_numbers<[1], [0], [0], [1], [0, 0, 1, 1], [], []>} : vector<8x256xbf16>, vector<256x64xbf16>, vector<8x64xf32> -> vector<8x64xf32>
    %47 = arith.addf %42, %46 : vector<8x64xf32>
    %48 = vector.extract_strided_slice %21 {offsets = [6, 0], sizes = [8, 256], strides = [1, 1]} : vector<20x256xbf16> to vector<8x256xbf16>
    %c5 = arith.constant 5 : index
    %c0_27 = arith.constant 0 : index
    %c0_28 = arith.constant 0 : index
    %49 = vector.load %arg3[%c5, %c0_27, %c0_28] : memref<9x256x64xbf16, #tpu.memory_space<vmem>>, vector<1x256x64xbf16>
    %50 = vector.shape_cast %49 : vector<1x256x64xbf16> to vector<256x64xbf16>
    %cst_29 = arith.constant dense<0.000000e+00> : vector<8x64xf32>
    %51 = tpu.matmul %48, %50, %cst_29 {dimension_numbers = #tpu.dot_dimension_numbers<[1], [0], [0], [1], [0, 0, 1, 1], [], []>} : vector<8x256xbf16>, vector<256x64xbf16>, vector<8x64xf32> -> vector<8x64xf32>
    %52 = arith.addf %47, %51 : vector<8x64xf32>
    %53 = vector.extract_strided_slice %21 {offsets = [8, 0], sizes = [8, 256], strides = [1, 1]} : vector<20x256xbf16> to vector<8x256xbf16>
    %c6 = arith.constant 6 : index
    %c0_30 = arith.constant 0 : index
    %c0_31 = arith.constant 0 : index
    %54 = vector.load %arg3[%c6, %c0_30, %c0_31] : memref<9x256x64xbf16, #tpu.memory_space<vmem>>, vector<1x256x64xbf16>
    %55 = vector.shape_cast %54 : vector<1x256x64xbf16> to vector<256x64xbf16>
    %cst_32 = arith.constant dense<0.000000e+00> : vector<8x64xf32>
    %56 = tpu.matmul %53, %55, %cst_32 {dimension_numbers = #tpu.dot_dimension_numbers<[1], [0], [0], [1], [0, 0, 1, 1], [], []>} : vector<8x256xbf16>, vector<256x64xbf16>, vector<8x64xf32> -> vector<8x64xf32>
    %57 = arith.addf %52, %56 : vector<8x64xf32>
    %58 = vector.extract_strided_slice %21 {offsets = [9, 0], sizes = [8, 256], strides = [1, 1]} : vector<20x256xbf16> to vector<8x256xbf16>
    %c7 = arith.constant 7 : index
    %c0_33 = arith.constant 0 : index
    %c0_34 = arith.constant 0 : index
    %59 = vector.load %arg3[%c7, %c0_33, %c0_34] : memref<9x256x64xbf16, #tpu.memory_space<vmem>>, vector<1x256x64xbf16>
    %60 = vector.shape_cast %59 : vector<1x256x64xbf16> to vector<256x64xbf16>
    %cst_35 = arith.constant dense<0.000000e+00> : vector<8x64xf32>
    %61 = tpu.matmul %58, %60, %cst_35 {dimension_numbers = #tpu.dot_dimension_numbers<[1], [0], [0], [1], [0, 0, 1, 1], [], []>} : vector<8x256xbf16>, vector<256x64xbf16>, vector<8x64xf32> -> vector<8x64xf32>
    %62 = arith.addf %57, %61 : vector<8x64xf32>
    %63 = vector.extract_strided_slice %21 {offsets = [10, 0], sizes = [8, 256], strides = [1, 1]} : vector<20x256xbf16> to vector<8x256xbf16>
    %c8 = arith.constant 8 : index
    %c0_36 = arith.constant 0 : index
    %c0_37 = arith.constant 0 : index
    %64 = vector.load %arg3[%c8, %c0_36, %c0_37] : memref<9x256x64xbf16, #tpu.memory_space<vmem>>, vector<1x256x64xbf16>
    %65 = vector.shape_cast %64 : vector<1x256x64xbf16> to vector<256x64xbf16>
    %cst_38 = arith.constant dense<0.000000e+00> : vector<8x64xf32>
    %66 = tpu.matmul %63, %65, %cst_38 {dimension_numbers = #tpu.dot_dimension_numbers<[1], [0], [0], [1], [0, 0, 1, 1], [], []>} : vector<8x256xbf16>, vector<256x64xbf16>, vector<8x64xf32> -> vector<8x64xf32>
    %67 = arith.addf %62, %66 : vector<8x64xf32>
    %68 = vector.shape_cast %67 : vector<8x64xf32> to vector<2x4x64xf32>
    %69 = vector.extract_strided_slice %68 {offsets = [0, 0, 0], sizes = [2, 2, 64], strides = [1, 1, 1]} : vector<2x4x64xf32> to vector<2x2x64xf32>
    %70 = vector.shape_cast %69 : vector<2x2x64xf32> to vector<1x2x2x64xf32>
    %c0_39 = arith.constant 0 : index
    %c0_40 = arith.constant 0 : index
    %c0_41 = arith.constant 0 : index
    %c0_42 = arith.constant 0 : index
    %71 = vector.load %arg4[%c0_39, %c0_40, %c0_41, %c0_42] : memref<1x2x2x64xf32, #tpu.memory_space<vmem>>, vector<1x2x2x64xf32>
    tpu.vector_store %arg4[%c0_39, %c0_40, %c0_41, %c0_42], %70 {strides = array<i32>} : memref<1x2x2x64xf32, #tpu.memory_space<vmem>>, vector<1x2x2x64xf32>,
    return
  }
  func.func @transform_0(%arg0: i32) -> (i32, i32, i32, i32) {
    %c0_i32 = arith.constant 0 : i32
    %c0_i32_0 = arith.constant 0 : i32
    %c0_i32_1 = arith.constant 0 : i32
    %c0_i32_2 = arith.constant 0 : i32
    return %arg0, %c0_i32, %c0_i32_0, %c0_i32_1 : i32, i32, i32, i32
  }
  func.func @transform_1(%arg0: i32) -> (i32, i32) {
    %c0_i32 = arith.constant 0 : i32
    %c0_i32_0 = arith.constant 0 : i32
    %c0_i32_1 = arith.constant 0 : i32
    return %c0_i32, %c0_i32_0 : i32, i32
  }
  func.func @transform_2(%arg0: i32) -> (i32, i32, i32) {
    %c0_i32 = arith.constant 0 : i32
    %c0_i32_0 = arith.constant 0 : i32
    %c0_i32_1 = arith.constant 0 : i32
    %c0_i32_2 = arith.constant 0 : i32
    return %c0_i32, %c0_i32_0, %c0_i32_1 : i32, i32, i32
  }
  func.func @transform_3(%arg0: i32) -> (i32, i32, i32, i32) {
    %c0_i32 = arith.constant 0 : i32
    %c0_i32_0 = arith.constant 0 : i32
    %c0_i32_1 = arith.constant 0 : i32
    %c0_i32_2 = arith.constant 0 : i32
    return %arg0, %c0_i32, %c0_i32_0, %c0_i32_1 : i32, i32, i32, i32
  }
}

</mosaic_0001>

<bundles_post_ra>
// kernel: tpu_custom_call.1
= control target key start
LH: loop header
LB: loop body
LE: loop exit
PB: predicated region body
PF: predicated region fallthrough
CT: control target
= control target key end

     0   :  { %8 = vsyncpa [#allocation3], 0  ;;  %s3594_s0 = inlined_call_operand.vmem [shape: f32[2,2,2,256], index: 0, kind: input, shape index: {}]   ;;  %s3595_s1 = inlined_call_operand.vmem [shape: f32[2,256], index: 1, kind: input, shape index: {}]   ;;  %s3596_s2 = inlined_call_operand.vmem [shape: bf16[9,256,64], index: 2, kind: input, shape index: {}]   ;;  %s3597_s3 = inlined_call_operand.hbm [shape: f32[2,2,2,64], index: 3, kind: output, shape index: {}]  }
   0x1   :  { %10 = vsyncpa [#allocation3 + $0x1], 0  ;;  %s3008_s12 = smov 0   ;;  %s3010_s13 = smov 0  }
   0x2   :  { %s3012_s14 = smov 0   ;;  %s3014_s15 = smov 0  }
   0x3 LB: > { %s3029_s16 = sadd.s32 4294967295, %s2983_s15   ;;  %s1888_s17 = sadd.s32 4294967294, %s2983_s15   ;;  %s2983_s15 = sphi %s3014_s15, %s3607_s15   ;;  %s2979_s14 = sphi %s3012_s14, %s3606_s14   ;;  %s2975_s13 = sphi %s3010_s13, %s3605_s13   ;;  %s2971_s12 = sphi %s3008_s12, %s3604_s12  }
   0x4   : > { %s3033_s18 = sadd.s32 1, %s2983_s15   ;;  %s91_s19 = sadd.s32 1, %s2979_s14 }
   0x5   : > { %s88_s20 = ssub.s32 %s2983_s15, %s3033_s18  ;;  %p101_p0 = scmp.ne.s32.totalorder %s2979_s14, %s2975_s13 }
   0x6   : > { %p89_p1 = scmp.eq.s32.totalorder %s88_s20, 0  ;;  %p102_p2 = scmp.eq.s32.totalorder %s3029_s16, 1 }
   0x7   : > { %p107_p3 = scmp.ne.s32.totalorder %s2975_s13, %s2971_s12  ;;  %p108_p4 = scmp.eq.s32.totalorder %s1888_s17, 1 }
   0x8   : > { %s3044_s21 = scalar_select %p89_p1, %s2979_s14, %s91_s19  }
   0x9   : > { %p3046_p5 = por %p102_p2, %p101_p0  ;;  %p3050_p6 = por %p108_p4, %p107_p3 }
   0xa   : > { %p1891_p7 = scmp.ge.s32.totalorder %s2983_s15, 1  ;;  %p140_p8 = scmp.lt.s32.totalorder %s2983_s15, 3 }
   0xc   : > { %p141_p9 = pnand %p1891_p7, %p140_p8 }
   0xd   : > { %p164_p10 = scmp.lt.s32.totalorder (!%p141_p9), %s3029_s16, 1  ;;  %s161_s6 = sand.u32 (!%p141_p9), 1, %s2975_s13  }
   0xe   : > { %144 = sbr.rel (%p141_p9) target bundleno = 317 (0x13d), region = 32  ;;  %s1892_s7 = sshll.u32 (!%p141_p9), %s161_s6, 2 }
   0xf   : > { %s2878_s8 = sshll.u32 (!%p141_p9), %s3029_s16, 2  ;;  %s163_s19 = scalar_lea.vmem (!%p141_p9), [#allocation2], %s1892_s7 }
  0x10   : > { %s2941_s28 = scalar_lea.hbm (!%p141_p9), %s3597_s3, 8 }
  0x13   : > { %v2757_v0 = vld [vmem:[%s3596_s2 + $0xb8] sm:$0xff]  ;;  %v2756_v4 = vld [vmem:[%s3596_s2 + $0xb0] sm:$0xff]  ;;  %v2755_v8 = vld [vmem:[%s3596_s2 + $0xa8] sm:$0xff]  ;;  %s165_s11 = scalar_select %p164_p10, %s3029_s16, 1  ;;  %vm179_vm0 = vcmask 1041408   ;;  %v2985_v56 = vmov 0  }
  0x14   : > { %v2765_v1 = vld [vmem:[%s3596_s2 + $0xf8] sm:$0xff]  ;;  %462 = vmatpush.bf16.msra.mxu0 %v2757_v0  ;;  %v2764_v5 = vld [vmem:[%s3596_s2 + $0xf0] sm:$0xff]  ;;  %v2763_v9 = vld [vmem:[%s3596_s2 + $0xe8] sm:$0xff]  ;;  %v268_v57 = vrot.slane %v2985_v56, 6  ;;  %vm251_vm1 = vcmask 1040384   ;;  %vm1807_vm6 = vcmask 517120  }
  0x15   : > { %v2741_v2 = vld [vmem:[%s3596_s2 + $0x38] sm:$0xff]  ;;  %475 = vmatpush.bf16.msra.mxu1 %v2765_v1  ;;  %v2740_v6 = vld [vmem:[%s3596_s2 + $0x30] sm:$0xff]  ;;  %v2739_v10 = vld [vmem:[%s3596_s2 + $0x28] sm:$0xff]  ;;  %s2733_s29 = sshll.u32 %s165_s11, 3  ;;  %vm252_vm2 = vsmask.f32 256 }
  0x16   : > { %v2749_v3 = vld [vmem:[%s3596_s2 + $0x78] sm:$0xff]  ;;  %591 = vmatpush.bf16.msra.mxu2 %v2741_v2  ;;  %v2748_v7 = vld [vmem:[%s3596_s2 + $0x70] sm:$0xff]  ;;  %v2747_v11 = vld [vmem:[%s3596_s2 + $0x68] sm:$0xff]  ;;  %s168_s17 = scalar_lea.vmem %s3594_s0, %s2733_s29  ;;  %v3202_v0 = vsel %vm179_vm0, 0, %v268_v57  ;;  %vm259_vm3 = vsmask.f32 1280 }
  0x17   : > { %604 = vmatpush.bf16.msra.mxu3 %v2749_v3  ;;  %v2754_v12 = vld [vmem:[%s3596_s2 + $0xa0] sm:$0xff]  ;;  %v2753_v16 = vld [vmem:[%s3596_s2 + $0x98] sm:$0xff]  ;;  %v2752_v21 = vld [vmem:[%s3596_s2 + $0x90] sm:$0xff]  ;;  %s1823_s11 = sshll.u32 %s163_s19, 4  ;;  %s1811_s16 = scalar_lea.sflag [#allocation3], %s161_s6  ;;  %s1824_s11 = int_to_ptr.vmem [resolvable:$true] %s1823_s11 }
  0x18   : > { %463 = vmatpush.bf16.msra.mxu0 %v2756_v4  ;;  %v2762_v13 = vld [vmem:[%s3596_s2 + $0xe0] sm:$0xff]  ;;  %v2761_v17 = vld [vmem:[%s3596_s2 + $0xd8] sm:$0xff]  ;;  %v2760_v22 = vld [vmem:[%s3596_s2 + $0xd0] sm:$0xff] }
  0x19   : > { %476 = vmatpush.bf16.msra.mxu1 %v2764_v5  ;;  %v2738_v14 = vld [vmem:[%s3596_s2 + $0x20] sm:$0xff]  ;;  %v2737_v18 = vld [vmem:[%s3596_s2 + $0x18] sm:$0xff]  ;;  %v2736_v24 = vld [vmem:[%s3596_s2 + $0x10] sm:$0xff] }
  0x1a   : > { %592 = vmatpush.bf16.msra.mxu2 %v2740_v6  ;;  %v2746_v15 = vld [vmem:[%s3596_s2 + $0x60] sm:$0xff]  ;;  %v2745_v19 = vld [vmem:[%s3596_s2 + $0x58] sm:$0xff]  ;;  %v2744_v25 = vld [vmem:[%s3596_s2 + $0x50] sm:$0xff] }
  0x1b   : > { %605 = vmatpush.bf16.msra.mxu3 %v2748_v7  ;;  %v170_v20 = vld [vmem:[%s3595_s1] ss:$2 sm:$0x3]  ;;  %v1895_v23 = vld [vmem:[%s3595_s1 + $0x1] ss:$2 sm:$0x3]  ;;  %vm3231_vm4 = vmand %vm251_vm1, %vm252_vm2 }
  0x1c   : > { %464 = vmatpush.bf16.msra.mxu0 %v2755_v8  ;;  %v176_v26 = vperm.slane %v170_v20, 0  ;;  %v177_v27 = vperm.slane %v170_v20, 1  ;;  %v185_v28 = vperm.slane %v1895_v23, 0  ;;  %v186_v29 = vperm.slane %v1895_v23, 1  ;;  %v173_v30 = vld [vmem:[%s168_s17] sm:$0xf]  ;;  %vm3237_vm5 = vmand %vm179_vm0, %vm259_vm3 }
  0x1d   : > { %477 = vmatpush.bf16.msra.mxu1 %v2763_v9  ;;  %v174_v31 = vld [vmem:[%s168_s17 + $0x4] sm:$0xf]  ;;  %v2751_v34 = vld [vmem:[%s3596_s2 + $0x88] sm:$0xff]  ;;  %v2773_v48 = vld [vmem:[%s3596_s2 + $0x138] sm:$0xff]  ;;  %s1822_s17 = scalar_lea.hbm %s3597_s3, %s2878_s8 }
  0x1e   : > { %593 = vmatpush.bf16.msra.mxu2 %v2739_v10  ;;  %v178_v32 = vrot.slane %v177_v27, 6  ;;  %v187_v33 = vrot.slane %v186_v29, 6  ;;  %v2759_v35 = vld [vmem:[%s3596_s2 + $0xc8] sm:$0xff]  ;;  %v2750_v42 = vld [vmem:[%s3596_s2 + $0x80] sm:$0xff]  ;;  %v2781_v49 = vld [vmem:[%s3596_s2 + $0x178] sm:$0xff]  ;;  %s1825_s20 = sshll.u32 %s1822_s17, 4  ;;  %s1826_s20 = int_to_ptr.hbm [resolvable:$true] %s1825_s20 }
  0x1f   : > { %606 = vmatpush.bf16.msra.mxu3 %v2747_v11  ;;  %v2735_v36 = vld [vmem:[%s3596_s2 + $0x8] sm:$0xff]  ;;  %v2758_v43 = vld [vmem:[%s3596_s2 + $0xc0] sm:$0xff]  ;;  %v2789_v52 = vld [vmem:[%s3596_s2 + $0x1b8] sm:$0xff]  ;;  %s2935_s24 = sshra.s32 %s1826_s20, 4  ;;  %s2936_s24 = int_to_ptr.hbm [resolvable:$true] %s2935_s24 }
  0x20   : > { %465 = vmatpush.bf16.msra.mxu0 %v2754_v12  ;;  %v2743_v37 = vld [vmem:[%s3596_s2 + $0x48] sm:$0xff]  ;;  %v180_v38 = vsel %vm179_vm0, %v176_v26, %v178_v32  ;;  %v188_v39 = vsel %vm179_vm0, %v185_v28, %v187_v33  ;;  %v2734_v46 = vld [vmem:[%s3596_s2] sm:$0xff]  ;;  %v2797_v53 = vld [vmem:[%s3596_s2 + $0x1f8] sm:$0xff]  ;;  %s2937_s25 = scalar_lea.hbm %s2936_s24, 4  ;;  %p2942_p0 = scmp.lt.s32.totalorder %s2936_s24, %s3597_s3 }
  0x21   : > { %478 = vmatpush.bf16.msra.mxu1 %v2762_v13  ;;  %v182_v40 = vmul.f32 %v180_v38, %v173_v30  ;;  %v183_v41 = vmul.f32 %v180_v38, %v174_v31  ;;  %v2742_v47 = vld [vmem:[%s3596_s2 + $0x40] sm:$0xff]  ;;  %v2772_v54 = vld [vmem:[%s3596_s2 + $0x130] sm:$0xff]  ;;  %v2771_v60 = vld [vmem:[%s3596_s2 + $0x128] sm:$0xff]  ;;  %p2938_p11 = scmp.ne.s32.totalorder %s2936_s24, %s2937_s25  ;;  %p2943_p1 = scmp.lt.s32.totalorder %s2941_s28, %s2937_s25 }
  0x22   : > { %594 = vmatpush.bf16.msra.mxu2 %v2738_v14  ;;  %v2780_v55 = vld [vmem:[%s3596_s2 + $0x170] sm:$0xff]  ;;  %v2779_v61 = vld [vmem:[%s3596_s2 + $0x168] sm:$0xff]  ;;  %v2770_v7 = vld [vmem:[%s3596_s2 + $0x120] sm:$0xff] }
  0x23   : > { %607 = vmatpush.bf16.msra.mxu3 %v2746_v15  ;;  %v190_v44 = vadd.f32 %v188_v39, %v182_v40  ;;  %v191_v45 = vadd.f32 %v188_v39, %v183_v41  ;;  %v2788_v58 = vld [vmem:[%s3596_s2 + $0x1b0] sm:$0xff]  ;;  %v2787_v62 = vld [vmem:[%s3596_s2 + $0x1a8] sm:$0xff]  ;;  %v2778_v8 = vld [vmem:[%s3596_s2 + $0x160] sm:$0xff]  ;;  %p2939_p12 = pnand %p2938_p11, %p3046_p5  ;;  %p2944_p2 = por %p2943_p1, %p2942_p0 }
  0x24   : > { %466 = vmatpush.bf16.msra.mxu0 %v2753_v16  ;;  %v2796_v59 = vld [vmem:[%s3596_s2 + $0x1f0] sm:$0xff]  ;;  %v2795_v63 = vld [vmem:[%s3596_s2 + $0x1e8] sm:$0xff]  ;;  %v2786_v11 = vld [vmem:[%s3596_s2 + $0x1a0] sm:$0xff] }
  0x25   : > { %479 = vmatpush.bf16.msra.mxu1 %v2761_v17  ;;  %v192_v50 = vmax.f32 %v190_v44, 0.0  ;;  %v193_v51 = vmax.f32 %v191_v45, 0.0  ;;  %v2794_v12 = vld [vmem:[%s3596_s2 + $0x1e0] sm:$0xff]  ;;  %v2777_v20 = vld [vmem:[%s3596_s2 + $0x158] sm:$0xff]  ;;  %v2768_v39 = vld [vmem:[%s3596_s2 + $0x110] sm:$0xff]  ;;  %p2940_p13 = pneg %p2939_p12 }
  0x26   : > { %595 = vmatpush.bf16.msra.mxu2 %v2737_v18  ;;  %v2793_v26 = vld [vmem:[%s3596_s2 + $0x1d8] sm:$0xff]  ;;  %v2776_v40 = vld [vmem:[%s3596_s2 + $0x150] sm:$0xff]  ;;  %v2783_v57 = vld [vmem:[%s3596_s2 + $0x188] sm:$0xff] }
  0x27   : > { %608 = vmatpush.bf16.msra.mxu3 %v2745_v19  ;;  %196 = vst [vmem:[#allocation1] ss:$4 sm:$0xff] %v192_v50  ;;  %v2769_v19 = vld [vmem:[%s3596_s2 + $0x118] sm:$0xff]  ;;  %v2792_v44 = vld [vmem:[%s3596_s2 + $0x1d0] sm:$0xff]  ;;  %p2945_p3 = pnand %p2944_p2, %p2940_p13 }
  0x28   : > { %467 = vmatpush.bf16.msra.mxu0 %v2752_v21  ;;  %200 = vst [vmem:[#allocation1 + $0x20] ss:$4 sm:$0xff] %v193_v51  ;;  %v2800_v38 = vld [vmem:[%s3596_s2 + $0x210] sm:$0xff] }
  0x29   : > { %480 = vmatpush.bf16.msra.mxu1 %v2760_v22 }
  0x2a   : > { %596 = vmatpush.bf16.msra.mxu2 %v2736_v24 }
  0x2b   : > { %609 = vmatpush.bf16.msra.mxu3 %v2744_v25  ;;  %v2785_v25 = vld [vmem:[%s3596_s2 + $0x198] sm:$0xff] }
  0x2c   : > { %468 = vmatpush.bf16.msra.mxu0 %v2751_v34 }
  0x2d   : > { %481 = vmatpush.bf16.msra.mxu1 %v2759_v35  ;;  %v2809_v35 = vld [vmem:[%s3596_s2 + $0x258] sm:$0xff] }
  0x2e   : > { %597 = vmatpush.bf16.msra.mxu2 %v2735_v36  ;;  %v197_v1 = vld.sshfl [vmem:[#allocation1] sm:$0xff pattern:$0x73625140]  ;;  %v198_v2 = vld.sshfl [vmem:[#allocation1 + $0x8] sm:$0xff pattern:$0x73625140] }
  0x2f   : > { %610 = vmatpush.bf16.msra.mxu3 %v2743_v37  ;;  %v201_v3 = vld.sshfl [vmem:[#allocation1 + $0x20] sm:$0xff pattern:$0x73625140]  ;;  %v202_v4 = vld.sshfl [vmem:[#allocation1 + $0x28] sm:$0xff pattern:$0x73625140]  ;;  %v207_v5 = vpack.c.bf16 %v198_v2, %v197_v1 }
  0x30   : > { %469 = vmatpush.bf16.msra.mxu0 %v2750_v42  ;;  %v208_v6 = vpack.c.bf16 %v202_v4, %v201_v3  ;;  %345 = vst [vmem:[#allocation1] ss:$4 sm:$0xff] %v3202_v0  ;;  %v2790_v1 = vld [vmem:[%s3596_s2 + $0x1c0] sm:$0xff] }
  0x31   : > { %482 = vmatpush.bf16.msra.mxu1 %v2758_v43  ;;  %v211_v9 = vunpack.c.l.b16 %v207_v5  ;;  %v212_v10 = vunpack.c.h.b16 %v207_v5  ;;  %v2784_v43 = vld [vmem:[%s3596_s2 + $0x190] sm:$0xff] }
  0x32   : > { %598 = vmatpush.bf16.msra.mxu2 %v2734_v46  ;;  %v213_v13 = vunpack.c.l.b16 %v208_v6  ;;  %v214_v14 = vunpack.c.h.b16 %v208_v6 }
  0x33   : > { %611 = vmatpush.bf16.msra.mxu3 %v2742_v47  ;;  %v215_v15 = vpack.c.b16 %v211_v9, %v211_v9  ;;  %v216_v16 = vpack.c.b16 %v212_v10, %v212_v10  ;;  %v2805_v10 = vld [vmem:[%s3596_s2 + $0x238] sm:$0xff] }
  0x34   : > { %759 = vmatpush.bf16.msrb.mxu0 %v2773_v48  ;;  %v217_v17 = vpack.c.b16 %v213_v13, %v213_v13  ;;  %v218_v18 = vpack.c.b16 %v214_v14, %v214_v14  ;;  %v2821_v14 = vld [vmem:[%s3596_s2 + $0x2b8] sm:$0xff] }
  0x35   : > { %772 = vmatpush.bf16.msrb.mxu1 %v2781_v49  ;;  %v220_v21 = vshrl.u32 %v215_v15, 16  ;;  %v223_v22 = vshll.u32 %v215_v15, 16  ;;  %v227_v23 = vshrl.u32 %v216_v16, 16  ;;  %v230_v24 = vshll.u32 %v216_v16, 16  ;;  %v2829_v15 = vld [vmem:[%s3596_s2 + $0x2f8] sm:$0xff]  ;;  %v2804_v16 = vld [vmem:[%s3596_s2 + $0x230] sm:$0xff] }
  0x36   : > { %922 = vmatpush.bf16.msrb.mxu2 %v2789_v52  ;;  %v234_v27 = vshrl.u32 %v217_v17, 16  ;;  %v237_v28 = vshll.u32 %v217_v17, 16  ;;  %v241_v29 = vshrl.u32 %v218_v18, 16  ;;  %v244_v30 = vshll.u32 %v218_v18, 16  ;;  %v2812_v17 = vld [vmem:[%s3596_s2 + $0x270] sm:$0xff] }
  0x37   : > { %935 = vmatpush.bf16.msrb.mxu3 %v2797_v53  ;;  %v222_v31 = vrot.slane %v220_v21, 7  ;;  %v229_v32 = vrot.slane %v227_v23, 7  ;;  %v2828_v21 = vld [vmem:[%s3596_s2 + $0x2f0] sm:$0xff]  ;;  %v2811_v23 = vld [vmem:[%s3596_s2 + $0x268] sm:$0xff] }
  0x38   : > { %760 = vmatpush.bf16.msrb.mxu0 %v2772_v54  ;;  %v236_v33 = vrot.slane %v234_v27, 7  ;;  %v243_v34 = vrot.slane %v241_v29, 7  ;;  %v2767_v54 = vld [vmem:[%s3596_s2 + $0x108] sm:$0xff]  ;;  %v2810_v27 = vld [vmem:[%s3596_s2 + $0x260] sm:$0xff] }
  0x39   : > { %773 = vmatpush.bf16.msrb.mxu1 %v2780_v55  ;;  %v225_v36 = vor.u32 %v223_v22, %v222_v31  ;;  %v232_v37 = vor.u32 %v230_v24, %v229_v32  ;;  %v2775_v55 = vld [vmem:[%s3596_s2 + $0x148] sm:$0xff]  ;;  %v2818_v32 = vld [vmem:[%s3596_s2 + $0x2a0] sm:$0xff] }
  0x3a   : > { %923 = vmatpush.bf16.msrb.mxu2 %v2788_v58  ;;  %v239_v41 = vor.u32 %v237_v28, %v236_v33  ;;  %v246_v42 = vor.u32 %v244_v30, %v243_v34  ;;  %v2791_v58 = vld [vmem:[%s3596_s2 + $0x1c8] sm:$0xff]  ;;  %v2826_v33 = vld [vmem:[%s3596_s2 + $0x2e0] sm:$0xff]  ;;  %v2801_v34 = vld [vmem:[%s3596_s2 + $0x218] sm:$0xff] }
  0x3b   : > { %936 = vmatpush.bf16.msrb.mxu3 %v2796_v59  ;;  %v254_v45 = vsel %vm3231_vm4, 0, %v225_v36  ;;  %v255_v46 = vsel %vm3231_vm4, 0, %v232_v37  ;;  %v2803_v22 = vld [vmem:[%s3596_s2 + $0x228] sm:$0xff]  ;;  %v2817_v36 = vld [vmem:[%s3596_s2 + $0x298] sm:$0xff] }
  0x3c   : > { %761 = vmatpush.bf16.msrb.mxu0 %v2771_v60  ;;  %v256_v47 = vsel %vm3231_vm4, 0, %v239_v41  ;;  %v257_v48 = vsel %vm3231_vm4, 0, %v246_v42  ;;  %v261_v49 = vsel %vm3237_vm5, %v254_v45, 0  ;;  %v262_v50 = vsel %vm3237_vm5, %v255_v46, 0  ;;  %v2819_v24 = vld [vmem:[%s3596_s2 + $0x2a8] sm:$0xff]  ;;  %v2825_v37 = vld [vmem:[%s3596_s2 + $0x2d8] sm:$0xff] }
  0x3d   : > { %774 = vmatpush.bf16.msrb.mxu1 %v2779_v61  ;;  %v263_v51 = vsel %vm3237_vm5, %v256_v47, 0  ;;  %v264_v52 = vsel %vm3237_vm5, %v257_v48, 0  ;;  %v269_v53 = vrot.slane %v262_v50, 6  ;;  %v2766_v61 = vld [vmem:[%s3596_s2 + $0x100] sm:$0xff]  ;;  %v2824_v41 = vld [vmem:[%s3596_s2 + $0x2d0] sm:$0xff]  ;;  %v2807_v45 = vld [vmem:[%s3596_s2 + $0x248] sm:$0xff] }
  0x3e   : > { %924 = vmatpush.bf16.msrb.mxu2 %v2787_v62  ;;  %v270_v56 = vrot.slane %v264_v52, 6  ;;  %v2774_v62 = vld [vmem:[%s3596_s2 + $0x140] sm:$0xff]  ;;  %v2815_v46 = vld [vmem:[%s3596_s2 + $0x288] sm:$0xff]  ;;  %v2837_v50 = vld [vmem:[%s3596_s2 + $0x338] sm:$0xff] }
  0x3f   : > { %937 = vmatpush.bf16.msrb.mxu3 %v2795_v63  ;;  %v3282_v59 = vsel %vm179_vm0, %v261_v49, %v269_v53  ;;  %v2782_v63 = vld [vmem:[%s3596_s2 + $0x180] sm:$0xff]  ;;  %v2823_v47 = vld [vmem:[%s3596_s2 + $0x2c8] sm:$0xff] }
  0x40   : > { %762 = vmatpush.bf16.msrb.mxu0 %v2770_v7  ;;  %v3285_v60 = vsel %vm179_vm0, %v263_v51, %v270_v56  ;;  %347 = vst [vmem:[#allocation1 + $0x1] ss:$4 sm:$0xff] %v3282_v59  ;;  %v2798_v48 = vld [vmem:[%s3596_s2 + $0x200] sm:$0xff]  ;;  %v2845_v51 = vld [vmem:[%s3596_s2 + $0x378] sm:$0xff]  ;;  %v2836_v56 = vld [vmem:[%s3596_s2 + $0x330] sm:$0xff] }
  0x41   : > { %775 = vmatpush.bf16.msrb.mxu1 %v2778_v8  ;;  %349 = vst [vmem:[#allocation1 + $0x2] ss:$4 sm:$0xff] %v3285_v60  ;;  %v2806_v49 = vld [vmem:[%s3596_s2 + $0x240] sm:$0xff] }
  0x42   : > { %925 = vmatpush.bf16.msrb.mxu2 %v2786_v11  ;;  %v2813_v11 = vld [vmem:[%s3596_s2 + $0x278] sm:$0xff]  ;;  %v2814_v52 = vld [vmem:[%s3596_s2 + $0x280] sm:$0xff] }
  0x43   : > { %938 = vmatpush.bf16.msrb.mxu3 %v2794_v12  ;;  %v2822_v53 = vld [vmem:[%s3596_s2 + $0x2c0] sm:$0xff] }
  0x44   : > { %763 = vmatpush.bf16.msrb.mxu0 %v2769_v19 }
  0x45   : > { %776 = vmatpush.bf16.msrb.mxu1 %v2777_v20  ;;  %v2820_v20 = vld [vmem:[%s3596_s2 + $0x2b0] sm:$0xff] }
  0x46   : > { %926 = vmatpush.bf16.msrb.mxu2 %v2785_v25  ;;  %v2827_v25 = vld [vmem:[%s3596_s2 + $0x2e8] sm:$0xff] }
  0x47   : > { %939 = vmatpush.bf16.msrb.mxu3 %v2793_v26  ;;  %v2802_v26 = vld [vmem:[%s3596_s2 + $0x220] sm:$0xff] }
  0x48   : > { %764 = vmatpush.bf16.msrb.mxu0 %v2768_v39  ;;  %v350_v2 = vld.sshfl [vmem:[#allocation1] sm:$0xff pattern:$0x73625140]  ;;  %v351_v3 = vld.sshfl [vmem:[#allocation1 + $0x8] sm:$0xff pattern:$0x73625140] }
  0x49   : > { %777 = vmatpush.bf16.msrb.mxu1 %v2776_v40  ;;  %v352_v4 = vshrl.u32 %v350_v2, 16  ;;  %v354_v5 = vshll.u32 %v350_v2, 16  ;;  %v358_v6 = vshrl.u32 %v351_v3, 16  ;;  %v360_v7 = vshll.u32 %v351_v3, 16  ;;  %488 = vst [vmem:[#allocation1] ss:$4 sm:$0xff] %v3202_v0 }
  0x4a   : > { %927 = vmatpush.bf16.msrb.mxu2 %v2784_v43  ;;  %490 = vst [vmem:[#allocation1 + $0x1] ss:$4 sm:$0xff] %v3282_v59  ;;  %v2808_v39 = vld [vmem:[%s3596_s2 + $0x250] sm:$0xff] }
  0x4b   : > { %940 = vmatpush.bf16.msrb.mxu3 %v2792_v44  ;;  %v356_v8 = vrot.slane %v354_v5, 1  ;;  %v362_v9 = vrot.slane %v360_v7, 1  ;;  %v2816_v40 = vld [vmem:[%s3596_s2 + $0x290] sm:$0xff]  ;;  %v2799_v44 = vld [vmem:[%s3596_s2 + $0x208] sm:$0xff] }
  0x4c   : > { %765 = vmatpush.bf16.msrb.mxu0 %v2767_v54  ;;  %v2853_v54 = vld [vmem:[%s3596_s2 + $0x3b8] sm:$0xff]  ;;  %v2852_v5 = vld [vmem:[%s3596_s2 + $0x3b0] sm:$0xff] }
  0x4d   : > { %778 = vmatpush.bf16.msrb.mxu1 %v2775_v55  ;;  %v357_v12 = vor.u32 %v356_v8, %v352_v4  ;;  %v363_v13 = vor.u32 %v362_v9, %v358_v6  ;;  %v2861_v55 = vld [vmem:[%s3596_s2 + $0x3f8] sm:$0xff]  ;;  %v2860_v6 = vld [vmem:[%s3596_s2 + $0x3f0] sm:$0xff]  ;;  %v2835_v8 = vld [vmem:[%s3596_s2 + $0x328] sm:$0xff] }
  0x4e   : > { %928 = vmatpush.bf16.msrb.mxu2 %v2783_v57  ;;  %v2844_v57 = vld [vmem:[%s3596_s2 + $0x370] sm:$0xff]  ;;  %v2843_v9 = vld [vmem:[%s3596_s2 + $0x368] sm:$0xff] }
  0x4f   : > { %941 = vmatpush.bf16.msrb.mxu3 %v2791_v58  ;;  %470 = vmatmul.bf16.vlgmr.msra.gmra.mxu0 %v357_v12  ;;  %v2834_v12 = vld [vmem:[%s3596_s2 + $0x320] sm:$0xff] }
  0x50   : > { %766 = vmatpush.bf16.msrb.mxu0 %v2766_v61  ;;  %483 = vmatmul.bf16.vlgmr.msra.gmra.mxu1 %v363_v13  ;;  %v2842_v13 = vld [vmem:[%s3596_s2 + $0x360] sm:$0xff] }
  0x51   : > { %779 = vmatpush.bf16.msrb.mxu1 %v2774_v62  ;;  %v491_v18 = vld.sshfl [vmem:[#allocation1] sm:$0xff pattern:$0x73625140]  ;;  %v492_v19 = vld.sshfl [vmem:[#allocation1 + $0x8] sm:$0xff pattern:$0x73625140] }
  0x52   : > { %929 = vmatpush.bf16.msrb.mxu2 %v2782_v63  ;;  %612 = vmatmul.bf16.vlgmr.msra.gmra.mxu3 %v492_v19  ;;  %650 = vst [vmem:[#allocation1] ss:$4 sm:$0xff] %v3202_v0  ;;  %v2858_v19 = vld [vmem:[%s3596_s2 + $0x3e0] sm:$0xff] }
  0x53   : > { %942 = vmatpush.bf16.msrb.mxu3 %v2790_v1  ;;  %599 = vmatmul.bf16.vlgmr.msra.gmra.mxu2 %v491_v18  ;;  %652 = vst [vmem:[#allocation1 + $0x1] ss:$4 sm:$0xff] %v3282_v59  ;;  %v2850_v18 = vld [vmem:[%s3596_s2 + $0x3a0] sm:$0xff] }
  0x54   : > { %1099 = vmatpush.bf16.msra.mxu0 %v2805_v10  ;;  %654 = vst [vmem:[#allocation1 + $0x2] ss:$4 sm:$0xff] %v3285_v60  ;;  %v2851_v10 = vld [vmem:[%s3596_s2 + $0x3a8] sm:$0xff] }
  0x55   : > { %1112 = vmatpush.bf16.msra.mxu1 %v2813_v11  ;;  %v2859_v11 = vld [vmem:[%s3596_s2 + $0x3e8] sm:$0xff] }
  0x56   : > { %1268 = vmatpush.bf16.msra.mxu2 %v2821_v14 }
  0x57   : > { %1281 = vmatpush.bf16.msra.mxu3 %v2829_v15 }
  0x58   : > { %1100 = vmatpush.bf16.msra.mxu0 %v2804_v16 }
  0x59   : > { %1113 = vmatpush.bf16.msra.mxu1 %v2812_v17 }
  0x5a   : > { %1269 = vmatpush.bf16.msra.mxu2 %v2820_v20  ;;  %v2833_v20 = vld [vmem:[%s3596_s2 + $0x318] sm:$0xff] }
  0x5b   : > { %1282 = vmatpush.bf16.msra.mxu3 %v2828_v21  ;;  %v655_v28 = vld.sshfl [vmem:[#allocation1] sm:$0xff pattern:$0x73625140]  ;;  %v657_v29 = vld.sshfl [vmem:[#allocation1 + $0x8] sm:$0xff pattern:$0x73625140] }
  0x5c   : > { %1101 = vmatpush.bf16.msra.mxu0 %v2803_v22  ;;  %v659_v30 = vrot.slane %v655_v28, 1  ;;  %v660_v31 = vrot.slane %v657_v29, 1  ;;  %819 = vst [vmem:[#allocation1] ss:$4 sm:$0xff] %v3282_v59  ;;  %v2841_v21 = vld [vmem:[%s3596_s2 + $0x358] sm:$0xff]  ;;  %v2848_v28 = vld [vmem:[%s3596_s2 + $0x390] sm:$0xff] }
  0x5d   : > { %1114 = vmatpush.bf16.msra.mxu1 %v2811_v23  ;;  %821 = vst [vmem:[#allocation1 + $0x1] ss:$4 sm:$0xff] %v3285_v60  ;;  %v2849_v22 = vld [vmem:[%s3596_s2 + $0x398] sm:$0xff]  ;;  %v2856_v29 = vld [vmem:[%s3596_s2 + $0x3d0] sm:$0xff] }
  0x5e   : > { %1270 = vmatpush.bf16.msra.mxu2 %v2819_v24  ;;  %v2857_v23 = vld [vmem:[%s3596_s2 + $0x3d8] sm:$0xff]  ;;  %v2832_v24 = vld [vmem:[%s3596_s2 + $0x310] sm:$0xff] }
  0x5f   : > { %1283 = vmatpush.bf16.msra.mxu3 %v2827_v25  ;;  %767 = vmatmul.bf16.vlgmr.msrb.gmra.mxu0 %v659_v30  ;;  %v2840_v25 = vld [vmem:[%s3596_s2 + $0x350] sm:$0xff]  ;;  %v2831_v30 = vld [vmem:[%s3596_s2 + $0x308] sm:$0xff] }
  0x60   : > { %1102 = vmatpush.bf16.msra.mxu0 %v2802_v26  ;;  %780 = vmatmul.bf16.vlgmr.msrb.gmra.mxu1 %v660_v31  ;;  %v2839_v31 = vld [vmem:[%s3596_s2 + $0x348] sm:$0xff] }
  0x61   : > { %1115 = vmatpush.bf16.msra.mxu1 %v2810_v27 }
  0x62   : > { %1271 = vmatpush.bf16.msra.mxu2 %v2818_v32  ;;  %v2847_v32 = vld [vmem:[%s3596_s2 + $0x388] sm:$0xff] }
  0x63   : > { %1284 = vmatpush.bf16.msra.mxu3 %v2826_v33  ;;  %v2855_v33 = vld [vmem:[%s3596_s2 + $0x3c8] sm:$0xff] }
  0x64   : > { %1103 = vmatpush.bf16.msra.mxu0 %v2801_v34  ;;  %v822_v42 = vld.sshfl [vmem:[#allocation1] sm:$0xff pattern:$0x73625140]  ;;  %v823_v43 = vld.sshfl [vmem:[#allocation1 + $0x8] sm:$0xff pattern:$0x73625140] }
  0x65   : > { %1116 = vmatpush.bf16.msra.mxu1 %v2809_v35  ;;  %930 = vmatmul.bf16.vlgmr.msrb.gmra.mxu2 %v822_v42  ;;  %982 = vst [vmem:[#allocation1] ss:$4 sm:$0xff] %v3282_v59  ;;  %v2830_v34 = vld [vmem:[%s3596_s2 + $0x300] sm:$0xff] }
  0x66   : > { %1272 = vmatpush.bf16.msra.mxu2 %v2817_v36  ;;  %943 = vmatmul.bf16.vlgmr.msrb.gmra.mxu3 %v823_v43  ;;  %984 = vst [vmem:[#allocation1 + $0x1] ss:$4 sm:$0xff] %v3285_v60  ;;  %v2838_v35 = vld [vmem:[%s3596_s2 + $0x340] sm:$0xff]  ;;  %v2869_v36 = vld [vmem:[%s3596_s2 + $0x438] sm:$0xff] }
  0x67   : > { %1285 = vmatpush.bf16.msra.mxu3 %v2825_v37  ;;  %986 = vst [vmem:[#allocation1 + $0x2] ss:$4 sm:$0xff] %v3202_v0  ;;  %v2877_v37 = vld [vmem:[%s3596_s2 + $0x478] sm:$0xff] }
  0x68   : > { %1104 = vmatpush.bf16.msra.mxu0 %v2800_v38  ;;  %v2846_v38 = vld [vmem:[%s3596_s2 + $0x380] sm:$0xff] }
  0x69   : > { %1117 = vmatpush.bf16.msra.mxu1 %v2808_v39  ;;  %v2854_v39 = vld [vmem:[%s3596_s2 + $0x3c0] sm:$0xff] }
  0x6a   : > { %1273 = vmatpush.bf16.msra.mxu2 %v2816_v40 }
  0x6b   : > { %1286 = vmatpush.bf16.msra.mxu3 %v2824_v41 }
  0x6c   : > { %1105 = vmatpush.bf16.msra.mxu0 %v2799_v44 }
  0x6d   : > { %1118 = vmatpush.bf16.msra.mxu1 %v2807_v45 }
  0x6e   : > { %1274 = vmatpush.bf16.msra.mxu2 %v2815_v46  ;;  %v987_v58 = vld.sshfl [vmem:[#allocation1] sm:$0xff pattern:$0x73625140]  ;;  %v988_v61 = vld.sshfl [vmem:[#allocation1 + $0x8] sm:$0xff pattern:$0x73625140] }
  0x6f   : > { %1287 = vmatpush.bf16.msra.mxu3 %v2823_v47  ;;  %v989_v62 = vshrl.u32 %v987_v58, 16  ;;  %v991_v63 = vshll.u32 %v987_v58, 16  ;;  %v995_v1 = vshrl.u32 %v988_v61, 16  ;;  %v997_v2 = vshll.u32 %v988_v61, 16  ;;  %1159 = vst [vmem:[#allocation1] ss:$4 sm:$0xff] %v3282_v59 }
  0x70   : > { %1106 = vmatpush.bf16.msra.mxu0 %v2798_v48  ;;  %1161 = vst [vmem:[#allocation1 + $0x1] ss:$4 sm:$0xff] %v3285_v60  ;;  %v2868_v46 = vld [vmem:[%s3596_s2 + $0x430] sm:$0xff]  ;;  %v2863_v58 = vld [vmem:[%s3596_s2 + $0x408] sm:$0xff] }
  0x71   : > { %1119 = vmatpush.bf16.msra.mxu1 %v2806_v49  ;;  %v993_v3 = vrot.slane %v991_v63, 1  ;;  %v999_v4 = vrot.slane %v997_v2, 1  ;;  %1163 = vst [vmem:[#allocation1 + $0x2] ss:$4 sm:$0xff] %v3202_v0  ;;  %v2876_v47 = vld [vmem:[%s3596_s2 + $0x470] sm:$0xff]  ;;  %v2871_v61 = vld [vmem:[%s3596_s2 + $0x448] sm:$0xff] }
  0x72   : > { %1275 = vmatpush.bf16.msra.mxu2 %v2814_v52  ;;  %v2875_v52 = vld [vmem:[%s3596_s2 + $0x468] sm:$0xff]  ;;  %v2870_v63 = vld [vmem:[%s3596_s2 + $0x440] sm:$0xff] }
  0x73   : > { %1288 = vmatpush.bf16.msra.mxu3 %v2822_v53  ;;  %v994_v7 = vor.u32 %v993_v3, %v989_v62  ;;  %v1000_v59 = vor.u32 %v999_v4, %v995_v1  ;;  %v2874_v53 = vld [vmem:[%s3596_s2 + $0x460] sm:$0xff] }
  0x74   : > { %1431 = vmatpush.bf16.msrb.mxu0 %v2837_v50  ;;  %v2862_v62 = vld [vmem:[%s3596_s2 + $0x400] sm:$0xff] }
  0x75   : > { %1444 = vmatpush.bf16.msrb.mxu1 %v2845_v51  ;;  %1107 = vmatmul.bf16.vlgmr.msra.gmra.mxu0 %v994_v7  ;;  %v2867_v51 = vld [vmem:[%s3596_s2 + $0x428] sm:$0xff] }
  0x76   : > { %1608 = vmatpush.bf16.msrb.mxu2 %v2853_v54  ;;  %1120 = vmatmul.bf16.vlgmr.msra.gmra.mxu1 %v1000_v59  ;;  %v2865_v54 = vld [vmem:[%s3596_s2 + $0x418] sm:$0xff] }
  0x77   : > { %1621 = vmatpush.bf16.msrb.mxu3 %v2861_v55  ;;  %v2873_v55 = vld [vmem:[%s3596_s2 + $0x458] sm:$0xff] }
  0x78   : > { %1432 = vmatpush.bf16.msrb.mxu0 %v2836_v56  ;;  %v1164_v14 = vld.sshfl [vmem:[#allocation1] sm:$0xff pattern:$0x73625140]  ;;  %v1166_v15 = vld.sshfl [vmem:[#allocation1 + $0x8] sm:$0xff pattern:$0x73625140] }
  0x79   : > { %1445 = vmatpush.bf16.msrb.mxu1 %v2844_v57  ;;  %v1168_v16 = vrot.slane %v1164_v14, 1  ;;  %v1169_v17 = vrot.slane %v1166_v15, 1  ;;  %1328 = vst [vmem:[#allocation1] ss:$4 sm:$0xff] %v3285_v60  ;;  %v2864_v56 = vld [vmem:[%s3596_s2 + $0x410] sm:$0xff] }
  0x7a   : > { %1609 = vmatpush.bf16.msrb.mxu2 %v2852_v5  ;;  %1330 = vst [vmem:[#allocation1 + $0x1] ss:$4 sm:$0xff] %v3202_v0  ;;  %v2872_v57 = vld [vmem:[%s3596_s2 + $0x450] sm:$0xff] }
  0x7b   : > { %1622 = vmatpush.bf16.msrb.mxu3 %v2860_v6  ;;  %1276 = vmatmul.bf16.vlgmr.msra.gmra.mxu2 %v1168_v16 }
  0x7c   : > { %1433 = vmatpush.bf16.msrb.mxu0 %v2835_v8  ;;  %1289 = vmatmul.bf16.vlgmr.msra.gmra.mxu3 %v1169_v17 }
  0x7d   : > { %1446 = vmatpush.bf16.msrb.mxu1 %v2843_v9 }
  0x7e   : > { %1610 = vmatpush.bf16.msrb.mxu2 %v2851_v10 }
  0x7f   : > { %1623 = vmatpush.bf16.msrb.mxu3 %v2859_v11 }
  0x80   : > { %1434 = vmatpush.bf16.msrb.mxu0 %v2834_v12 }
  0x81   : > { %1447 = vmatpush.bf16.msrb.mxu1 %v2842_v13  ;;  %v1331_v26 = vld.sshfl [vmem:[#allocation1] sm:$0xff pattern:$0x73625140]  ;;  %v1332_v27 = vld.sshfl [vmem:[#allocation1 + $0x8] sm:$0xff pattern:$0x73625140] }
  0x82   : > { %1611 = vmatpush.bf16.msrb.mxu2 %v2850_v18  ;;  %1491 = vst [vmem:[#allocation1] ss:$4 sm:$0xff] %v3285_v60 }
  0x83   : > { %1624 = vmatpush.bf16.msrb.mxu3 %v2858_v19  ;;  %1493 = vst [vmem:[#allocation1 + $0x1] ss:$4 sm:$0xff] %v3202_v0 }
  0x84   : > { %1435 = vmatpush.bf16.msrb.mxu0 %v2833_v20  ;;  %1495 = vst [vmem:[#allocation1 + $0x2] ss:$4 sm:$0xff] %v3202_v0 }
  0x85   : > { %1448 = vmatpush.bf16.msrb.mxu1 %v2841_v21 }
  0x86   : > { %1612 = vmatpush.bf16.msrb.mxu2 %v2849_v22 }
  0x87   : > { %1625 = vmatpush.bf16.msrb.mxu3 %v2857_v23 }
  0x88   : > { %1436 = vmatpush.bf16.msrb.mxu0 %v2832_v24 }
  0x89   : > { %1449 = vmatpush.bf16.msrb.mxu1 %v2840_v25 }
  0x8a   : > { %1613 = vmatpush.bf16.msrb.mxu2 %v2848_v28 }
  0x8b   : > { %1626 = vmatpush.bf16.msrb.mxu3 %v2856_v29  ;;  %v1496_v40 = vld.sshfl [vmem:[#allocation1] sm:$0xff pattern:$0x73625140]  ;;  %v1497_v41 = vld.sshfl [vmem:[#allocation1 + $0x8] sm:$0xff pattern:$0x73625140] }
  0x8c   : > { %1437 = vmatpush.bf16.msrb.mxu0 %v2831_v30  ;;  %v1498_v42 = vshrl.u32 %v1496_v40, 16  ;;  %v1500_v43 = vshll.u32 %v1496_v40, 16  ;;  %v1504_v44 = vshrl.u32 %v1497_v41, 16  ;;  %v1506_v45 = vshll.u32 %v1497_v41, 16  ;;  %1668 = vst [vmem:[#allocation1] ss:$4 sm:$0xff] %v3285_v60 }
  0x8d   : > { %1450 = vmatpush.bf16.msrb.mxu1 %v2839_v31  ;;  %1670 = vst [vmem:[#allocation1 + $0x1] ss:$4 sm:$0xff] %v3202_v0 }
  0x8e   : > { %1614 = vmatpush.bf16.msrb.mxu2 %v2847_v32  ;;  %v1502_v48 = vrot.slane %v1500_v43, 1  ;;  %v1508_v49 = vrot.slane %v1506_v45, 1  ;;  %1672 = vst [vmem:[#allocation1 + $0x2] ss:$4 sm:$0xff] %v3202_v0  ;;  %v2866_v0 = vld [vmem:[%s3596_s2 + $0x420] sm:$0xff] }
  0x8f   : > { %1627 = vmatpush.bf16.msrb.mxu3 %v2855_v33 }
  0x90   : > { %1438 = vmatpush.bf16.msrb.mxu0 %v2830_v34  ;;  %v1503_v60 = vor.u32 %v1502_v48, %v1498_v42  ;;  %v1509_v50 = vor.u32 %v1508_v49, %v1504_v44 }
  0x91   : > { %1451 = vmatpush.bf16.msrb.mxu1 %v2838_v35 }
  0x92   : > { %1615 = vmatpush.bf16.msrb.mxu2 %v2846_v38 }
  0x93   : > { %1628 = vmatpush.bf16.msrb.mxu3 %v2854_v39  ;;  %1439 = vmatmul.bf16.vlgmr.msrb.gmra.mxu0 %v1331_v26 }
  0x94   : > { %1777 = vmatpush.bf16.msra.mxu0 %v2869_v36  ;;  %1452 = vmatmul.bf16.vlgmr.msrb.gmra.mxu1 %v1332_v27 }
  0x95   : > { %1790 = vmatpush.bf16.msra.mxu1 %v2877_v37  ;;  %1616 = vmatmul.bf16.vlgmr.msrb.gmra.mxu2 %v1503_v60  ;;  %v1673_v1 = vld.sshfl [vmem:[#allocation1] sm:$0xff pattern:$0x73625140]  ;;  %v1675_v2 = vld.sshfl [vmem:[#allocation1 + $0x8] sm:$0xff pattern:$0x73625140] }
  0x96   : > { %1629 = vmatmul.bf16.vlgmr.msrb.gmra.mxu3 %v1509_v50  ;;  %v1677_v3 = vrot.slane %v1673_v1, 1  ;;  %v1678_v4 = vrot.slane %v1675_v2, 1 }
  0x98   : > { %1778 = vmatpush.bf16.msra.mxu0 %v2868_v46 }
  0x99   : > { %1791 = vmatpush.bf16.msra.mxu1 %v2876_v47 }
  0x9c   : > { %1779 = vmatpush.bf16.msra.mxu0 %v2867_v51 }
  0x9d   : > { %1792 = vmatpush.bf16.msra.mxu1 %v2875_v52 }
  0xa0   : > { %1780 = vmatpush.bf16.msra.mxu0 %v2866_v0 }
  0xa1   : > { %1793 = vmatpush.bf16.msra.mxu1 %v2874_v53 }
  0xa4   : > { %1781 = vmatpush.bf16.msra.mxu0 %v2865_v54 }
  0xa5   : > { %1794 = vmatpush.bf16.msra.mxu1 %v2873_v55 }
  0xa8   : > { %1782 = vmatpush.bf16.msra.mxu0 %v2864_v56 }
  0xa9   : > { %1795 = vmatpush.bf16.msra.mxu1 %v2872_v57 }
  0xac   : > { %1783 = vmatpush.bf16.msra.mxu0 %v2863_v58 }
  0xad   : > { %1796 = vmatpush.bf16.msra.mxu1 %v2871_v61 }
  0xb0   : > { %1784 = vmatpush.bf16.msra.mxu0 %v2862_v62 }
  0xb1   : > { %1797 = vmatpush.bf16.msra.mxu1 %v2870_v63 }
  0xb3   : > { %1785 = vmatmul.bf16.vlgmr.msra.gmra.mxu0 %v1677_v3 }
  0xb4   : > { %1798 = vmatmul.bf16.vlgmr.msra.gmra.mxu1 %v1678_v4 }
  0xcc   : > { %v471_v5 = vpop.f32.mrf.mxu0 }
  0xcd   : > { %v484_v6 = vpop.f32.mrf.mxu1 }
  0xce   : > { %v485_v7 = vadd.f32 %v484_v6, %v471_v5 }
  0xd4   : > { %v473_v59 = vpop.f32.mrf.mxu0 }
  0xd5   : > { %v486_v8 = vpop.f32.mrf.mxu1  ;;  %v613_v10 = vpop.f32.mrf.mxu3 }
  0xd6   : > { %v600_v9 = vpop.f32.mrf.mxu2 }
  0xd7   : > { %v601_v11 = vadd.f32 %v600_v9, %v485_v7 }
  0xd9   : > { %v614_v12 = vadd.f32 %v613_v10, %v601_v11 }
  0xdc   : > { %v768_v13 = vpop.f32.mrf.mxu0 }
  0xdd   : > { %v781_v14 = vpop.f32.mrf.mxu1  ;;  %v615_v16 = vpop.f32.mrf.mxu3 }
  0xde   : > { %v602_v15 = vpop.f32.mrf.mxu2  ;;  %v782_v17 = vadd.f32 %v781_v14, %v768_v13 }
  0xe0   : > { %v785_v18 = vadd.f32 %v782_v17, %v614_v12 }
  0xe4   : > { %v770_v19 = vpop.f32.mrf.mxu0 }
  0xe5   : > { %v783_v20 = vpop.f32.mrf.mxu1 }
  0xe8   : > { %v931_v21 = vpop.f32.mrf.mxu2 }
  0xe9   : > { %v944_v22 = vpop.f32.mrf.mxu3 }
  0xea   : > { %v945_v41 = vadd.f32 %v944_v22, %v931_v21 }
  0xec   : > { %v948_v43 = vadd.f32 %v945_v41, %v785_v18 }
  0xf0   : > { %v933_v23 = vpop.f32.mrf.mxu2 }
  0xf1   : > { %v946_v24 = vpop.f32.mrf.mxu3 }
  0xf2   : > { %v1108_v25 = vpop.f32.mrf.mxu0 }
  0xf3   : > { %v1121_v26 = vpop.f32.mrf.mxu1 }
  0xf4   : > { %v1122_v42 = vadd.f32 %v1121_v26, %v1108_v25 }
  0xf6   : > { %v1125_v45 = vadd.f32 %v1122_v42, %v948_v43 }
  0xfa   : > { %v1110_v27 = vpop.f32.mrf.mxu0 }
  0xfb   : > { %v1123_v28 = vpop.f32.mrf.mxu1 }
  0xfe   : > { %v1277_v29 = vpop.f32.mrf.mxu2 }
  0xff   : > { %v1290_v30 = vpop.f32.mrf.mxu3 }
 0x100   : > { %v1291_v44 = vadd.f32 %v1290_v30, %v1277_v29 }
 0x102   : > { %v1294_v47 = vadd.f32 %v1291_v44, %v1125_v45 }
 0x106   : > { %v1279_v31 = vpop.f32.mrf.mxu2 }
 0x107   : > { %v1292_v32 = vpop.f32.mrf.mxu3 }
 0x110   : > { %v1440_v33 = vpop.f32.mrf.mxu0 }
 0x111   : > { %v1453_v34 = vpop.f32.mrf.mxu1 }
 0x112   : > { %v1454_v46 = vadd.f32 %v1453_v34, %v1440_v33 }
 0x114   : > { %v1457_v49 = vadd.f32 %v1454_v46, %v1294_v47 }
 0x118   : > { %v1442_v35 = vpop.f32.mrf.mxu0  ;;  %v1617_v37 = vpop.f32.mrf.mxu2 }
 0x119   : > { %v1455_v36 = vpop.f32.mrf.mxu1  ;;  %v1630_v38 = vpop.f32.mrf.mxu3 }
 0x11a   : > { %v1631_v48 = vadd.f32 %v1630_v38, %v1617_v37 }
 0x11c   : > { %v1634_v51 = vadd.f32 %v1631_v48, %v1457_v49 }
 0x120   : > { %v1619_v39 = vpop.f32.mrf.mxu2 }
 0x121   : > { %v1632_v40 = vpop.f32.mrf.mxu3 }
 0x130   : > { %v1786_v60 = vpop.f32.mrf.mxu0 }
 0x131   : > { %v1799_v50 = vpop.f32.mrf.mxu1 }
 0x132   : > { %v1800_v52 = vadd.f32 %v1799_v50, %v1786_v60 }
 0x134   : > { %v1803_v0 = vadd.f32 %v1800_v52, %v1634_v51 }
 0x136   : > { %v1805_v53 = vrot.slane %v1803_v0, 4  ;;  %1808 = vst.msk [vmem:[%s163_s19] sm:$0x3] %vm1807_vm6, %v1803_v0 }
 0x138   : > { %1809 = vst.msk [vmem:[%s163_s19 + $0x2] sm:$0x3] %vm1807_vm6, %v1805_v53  ;;  %v1788_v54 = vpop.f32.mrf.mxu0 }
 0x139   : > { %v1801_v55 = vpop.f32.mrf.mxu1 }
 0x13a   : > { %2948 = shalt.err (!%p2945_p3)
}
 0x13b   : > { %s2986_s4 = smov 32   ;;  %s2987_s5 = smov 2  }
 0x13c   : > { %2879 = dma.vmem_to_hbm [thread:$0]  (%p3046_p5), %s1824_s11, 64, %s1826_s20, %s1811_s16, %s2986_s4, %s2986_s4, %s2987_s5  }
 0x13d PF: > { %p2885_p4 = scmp.ge.s32.totalorder %s2983_s15, 2  ;;  %s1840_s6 = sand.u32 1, %s2971_s12  }
 0x13e   : > { %s1841_s7 = scalar_lea.sflag [#allocation3], %s1840_s6 }
 0x13f   : > { %p2882_p7 = pnand %p2885_p4, %p3050_p6 }
 0x141   : > { %p2883_p8 = pneg %p2882_p7 }
 0x143   : > { %2966 = dma.done.wait (%p2883_p8), %s1841_s7, 64  }
 0x144   : > { %2968 = vsyncadd (%p2883_p8), %s1841_s7, 4294967232  ;;  %p13_p9 = scmp.ge.s32.totalorder %s3033_s18, 4   ;;  %s3604_s12 = smov %s2975_s13 }
 0x145   : > { %s3605_s13 = smov %s2979_s14  ;;  %s3606_s14 = smov %s3044_s21 }
 0x146   : > { %s3607_s15 = smov %s3033_s18  ;;  %15 = sbr.rel (!%p13_p9) target bundleno = 3 (0x3), region = 92 }
 0x14b   :  { %1847 = vsyncpa [#allocation3], 1 }
 0x14c   :  { %1849 = vsyncpa [#allocation3 + $0x1], 1 }

</bundles_post_ra>
